<compile_context>
chip_gen: v6e
topology: v6e:2x2x1
jax: 0.10.0
libtpu: 0.0.40
codegen_flags: <defaults>
</compile_context>

<pallas_src>
import functools
import math

import jax
import jax.numpy as jnp
from jax import lax
from jax.experimental import pallas as pl
from jax.experimental.pallas import tpu as pltpu

EPS = 1e-5  # torch.nn.LayerNorm default


def _round_up(n, m):
    return ((n + m - 1) // m) * m


def _cdiv(a, b):
    return (a + b - 1) // b


def _sublane(dtype):
    # 8 rows per sublane tile for 4-byte dtypes, 16 for bf16, 32 for int8/fp8.
    return max(8, 32 // jnp.dtype(dtype).itemsize)


@functools.lru_cache(maxsize=1)
def _vmem_budget_bytes():
    """Per-generation VMEM budget for tile sizing (leaves compiler headroom)."""
    cap = 64 * 1024 * 1024  # conservative default = v7x per-core VMEM
    try:
        info = pltpu.get_tpu_info()
        cap = int(getattr(info, "vmem_capacity_bytes", cap)) or cap
    except Exception:
        pass
    # ~70% of physical: ~45 MiB on v7x (64 MiB/TC), ~90 MiB on v5e/v6e (128 MiB).
    return int(min((cap * 7) // 10, 100 * 1024 * 1024))


def _prenorm_linear_kernel(x_ref, seg_ref, w_ref, b_ref, o_ref, *scratch,
                           pack, inv_d, cache_xn):
    """One (rt, Dp) row tile: o = per-segment LayerNorm(x) @ W_fused + b_fused."""

    def normalized():
        x = x_ref[...].astype(jnp.float32)
        if pack == 1:
            # Plain rows: standard two-pass (centered) mean / variance in f32.
            mean = jnp.sum(x, axis=-1, keepdims=True) * inv_d
            d = x - mean
            var = jnp.sum(d * d, axis=-1, keepdims=True) * inv_d
            return d * lax.rsqrt(var + EPS)
        # Packed rows: each kernel row holds `pack` logical rows of width D.
        # seg (seg_rows, Dp) is a 0/1 segment-indicator; segment reductions and
        # the broadcast back are small MXU matmuls (no reshapes / relayouts).
        seg = seg_ref[...]
        dims = (((1,), (1,)), ((), ()))          # contract last dims (like q@k^T)
        s1 = lax.dot_general(x, seg, dims, preferred_element_type=jnp.float32)
        mean_b = jnp.dot(s1 * inv_d, seg, preferred_element_type=jnp.float32)
        d = x - mean_b
        s2 = lax.dot_general(d * d, seg, dims, preferred_element_type=jnp.float32)
        rstd_b = jnp.dot(lax.rsqrt(s2 * inv_d + EPS), seg,
                         preferred_element_type=jnp.float32)
        return d * rstd_b

    if cache_xn:
        # Column-tiled path: compute the normalized activations once per row tile
        # (at the first column block) and reuse them for every column tile.
        xn_ref = scratch[0]

        @pl.when(pl.program_id(1) == 0)
        def _():
            xn_ref[...] = normalized().astype(xn_ref.dtype)

        xn = xn_ref[...]
    else:
        xn = normalized().astype(w_ref.dtype)

    y = jnp.dot(xn, w_ref[...], preferred_element_type=jnp.float32) + b_ref[...]
    o_ref[...] = y.astype(o_ref.dtype)


@jax.jit
def prenorm_linear(x, gamma, beta, w, b):
    """PreNorm(dim, nn.Linear): LayerNorm over the last dim, then x @ W + b."""
    B, S, D = x.shape
    DO = w.shape[1]
    N = B * S
    x2 = x.reshape(N, D)

    # ---- Fold the LayerNorm affine (gamma, beta) into the linear layer (f32) ----
    w32 = w.astype(jnp.float32)
    w_fused = gamma.astype(jnp.float32)[:, None] * w32                    # (D, DO)
    b_fused = beta.astype(jnp.float32) @ w32 + b.astype(jnp.float32)      # (DO,)

    # ---- Lane-dense packing for narrow outputs (DO < 128) ----
    pack = 1
    if DO < 128:
        cand = 128 // math.gcd(DO, 128)          # smallest pack with pack*DO % 128 == 0
        if cand * D <= 2048:                     # keep packed rows a sane width
            pack = cand
    N_pad = _round_up(N, pack)
    if N_pad != N:
        x2 = jnp.pad(x2, ((0, N_pad - N), (0, 0)))   # zero rows -> LN(0)=0 -> b_fused
    Np, Dp, DOp = N_pad // pack, pack * D, pack * DO
    x_packed = x2.reshape(Np, Dp)

    if pack > 1:
        # Block-diagonal fused weight: one matmul handles all packed segments.
        w_big = jnp.kron(jnp.eye(pack, dtype=jnp.float32), w_fused).astype(w.dtype)
        b_big = jnp.tile(b_fused, pack).reshape(1, DOp)
    else:
        w_big = w_fused.astype(w.dtype)
        b_big = b_fused.reshape(1, DOp)

    # Segment-indicator matrix (rows padded to a multiple of 8; pad rows are zero
    # so they contribute nothing).  Unused in the pack == 1 kernel path.
    seg_rows = _round_up(pack, 8)
    seg = (jnp.arange(seg_rows, dtype=jnp.int32)[:, None]
           == (jnp.arange(Dp, dtype=jnp.int32)[None, :] // D)).astype(jnp.float32)

    # ---- Byte-budgeted tile sizes (per TPU generation) ----
    budget = _vmem_budget_bytes()
    x_item = x_packed.dtype.itemsize
    w_item = jnp.dtype(w_big.dtype).itemsize
    o_item = jnp.dtype(x.dtype).itemsize
    sub = _sublane(x.dtype)

    # Column tile: keep the full fused weight resident when its double-buffered
    # footprint fits ~1/3 of the budget; otherwise lane-dense 128-multiples.
    ct = DOp
    while ct > 128 and 2 * Dp * ct * w_item > budget // 3:
        ct = _round_up(ct // 2, 128)
    cache_xn = ct < DOp

    # Row tile: as large as the remaining budget allows (double-buffered x and out
    # tiles + optional xn scratch) so per-step DMA traffic is MiB-scale.
    fixed = 2 * Dp * ct * w_item + 2 * ct * 4 + seg_rows * Dp * 4
    per_row = 2 * Dp * x_item + 2 * ct * o_item + (Dp * w_item if cache_xn else 0)
    rt = max(sub, ((max(budget - fixed, per_row)) // per_row) // sub * sub)
    rt = min(rt, 8192, _round_up(Np, sub))

    # Give both v7x TensorCores work when the row grid would collapse to a single block.
    if _cdiv(Np, rt) == 1 and Np >= 2 * sub:
        rt = _round_up(_cdiv(Np, 2), sub)

    grid = (_cdiv(Np, rt), _cdiv(DOp, ct))
    kernel = functools.partial(_prenorm_linear_kernel,
                               pack=pack, inv_d=1.0 / D, cache_xn=cache_xn)
    scratch_shapes = [pltpu.VMEM((rt, Dp), w_big.dtype)] if cache_xn else []

    out = pl.pallas_call(
        kernel,
        out_shape=jax.ShapeDtypeStruct((Np, DOp), x.dtype),
        grid_spec=pltpu.PrefetchScalarGridSpec(
            num_scalar_prefetch=0,
            grid=grid,
            in_specs=[
                pl.BlockSpec((rt, Dp), lambda i, j: (i, 0)),
                pl.BlockSpec((seg_rows, Dp), lambda i, j: (0, 0)),
                pl.BlockSpec((Dp, ct), lambda i, j: (0, j)),
                pl.BlockSpec((1, ct), lambda i, j: (0, j)),
            ],
            out_specs=pl.BlockSpec((rt, ct), lambda i, j: (i, j)),
            scratch_shapes=scratch_shapes,
        ),
        compiler_params=pltpu.CompilerParams(
            dimension_semantics=("parallel",
                                 "arbitrary" if cache_xn else "parallel"),
            vmem_limit_bytes=int(min(budget + 8 * 1024 * 1024,
                                     120 * 1024 * 1024))),
    )(x_packed, seg, w_big, b_big)

    out = out.reshape(N_pad, DO)[:N]
    return out.reshape(B, S, DO)


def reference(x, gamma, beta, w, b):
    x = x.astype(jnp.float32)
    mean = jnp.mean(x, axis=-1, keepdims=True)
    var = jnp.mean((x - mean) ** 2, axis=-1, keepdims=True)
    xn = (x - mean) / jnp.sqrt(var + EPS) * gamma + beta
    return xn @ w.astype(jnp.float32) + b.astype(jnp.float32)


if __name__ == "__main__":
    key = jax.random.PRNGKey(0)
    B, S, D = 2, 8, 32   # batch=2, seq(categories)=8, hidden dim=32

    kx, kw, kb, kg, kbeta = jax.random.split(key, 5)
    x = jax.random.normal(kx, (B, S, D), dtype=jnp.float32)

    # LayerNorm params (slightly perturbed from the ones/zeros default so the
    # affine folding is actually exercised).
    gamma = 1.0 + 0.1 * jax.random.normal(kg, (D,), dtype=jnp.float32)
    beta = 0.1 * jax.random.normal(kbeta, (D,), dtype=jnp.float32)

    # fn = Linear(D, D) with deterministic init
    w = jax.random.normal(kw, (D, D), dtype=jnp.float32) * (1.0 / jnp.sqrt(D))
    b = jax.random.normal(kb, (D,), dtype=jnp.float32) * 0.01

    out = prenorm_linear(x, gamma, beta, w, b)
    jax.block_until_ready(out)

    ref = reference(x, gamma, beta, w, b)
    assert out.shape == (B, S, D)
    err = float(jnp.max(jnp.abs(out - ref)))
    assert jnp.allclose(out, ref, atol=1e-4, rtol=1e-4), err

    print("KERNEL_OK")
</pallas_src>

<mosaic_0001>
module attributes {stable_mosaic.version = 11 : i64} {
  func.func @_prenorm_linear_kernel(%arg0: i32, %arg1: i32, %arg2: memref<8x128xf32, #tpu.memory_space<vmem>>, %arg3: memref<8x128xf32, #tpu.memory_space<vmem>>, %arg4: memref<128x128xf32, #tpu.memory_space<vmem>>, %arg5: memref<1x128xf32, #tpu.memory_space<vmem>>, %arg6: memref<8x128xf32, #tpu.memory_space<vmem>>) attributes {dimension_semantics = [#tpu.dimension_semantics<parallel>, #tpu.dimension_semantics<parallel>], iteration_bounds = array<i64: 1, 1>, scalar_prefetch = 0 : i64, scratch_operands = 0 : i64, tpu.core_type = #tpu.core_type<tc>, window_params = [{transform_indices = @transform_0, window_bounds = array<i64: 8, 128>}, {pipeline_mode = #tpu.pipeline_mode<synchronous>, transform_indices = @transform_1, window_bounds = array<i64: 8, 128>}, {transform_indices = @transform_2, window_bounds = array<i64: 128, 128>}, {transform_indices = @transform_3, window_bounds = array<i64: 1, 128>}, {transform_indices = @transform_4, window_bounds = array<i64: 8, 128>}]} {
    %c0 = arith.constant 0 : index
    %c0_0 = arith.constant 0 : index
    %0 = vector.load %arg2[%c0, %c0_0] : memref<8x128xf32, #tpu.memory_space<vmem>>, vector<8x128xf32>
    %c0_1 = arith.constant 0 : index
    %c0_2 = arith.constant 0 : index
    %1 = vector.load %arg3[%c0_1, %c0_2] : memref<8x128xf32, #tpu.memory_space<vmem>>, vector<8x128xf32>
    %cst = arith.constant dense<0.000000e+00> : vector<8x8xf32>
    %2 = tpu.matmul %0, %1, %cst {dimension_numbers = #tpu.dot_dimension_numbers<[1], [1], [0], [0], [0, 0, 1, 0], [], []>} : vector<8x128xf32>, vector<8x128xf32>, vector<8x8xf32> -> vector<8x8xf32>
    %cst_3 = arith.constant 3.125000e-02 : f32
    %3 = vector.broadcast %cst_3 : f32 to vector<8x8xf32>
    %4 = arith.mulf %2, %3 : vector<8x8xf32>
    %cst_4 = arith.constant dense<0.000000e+00> : vector<8x128xf32>
    %5 = tpu.matmul %4, %1, %cst_4 {dimension_numbers = #tpu.dot_dimension_numbers<[1], [0], [0], [1], [0, 0, 1, 1], [], []>} : vector<8x8xf32>, vector<8x128xf32>, vector<8x128xf32> -> vector<8x128xf32>
    %6 = arith.subf %0, %5 : vector<8x128xf32>
    %7 = arith.mulf %6, %6 : vector<8x128xf32>
    %cst_5 = arith.constant dense<0.000000e+00> : vector<8x8xf32>
    %8 = tpu.matmul %7, %1, %cst_5 {dimension_numbers = #tpu.dot_dimension_numbers<[1], [1], [0], [0], [0, 0, 1, 0], [], []>} : vector<8x128xf32>, vector<8x128xf32>, vector<8x8xf32> -> vector<8x8xf32>
    %cst_6 = arith.constant 3.125000e-02 : f32
    %9 = vector.broadcast %cst_6 : f32 to vector<8x8xf32>
    %10 = arith.mulf %8, %9 : vector<8x8xf32>
    %cst_7 = arith.constant 9.99999974E-6 : f32
    %11 = vector.broadcast %cst_7 : f32 to vector<8x8xf32>
    %12 = arith.addf %10, %11 : vector<8x8xf32>
    %13 = math.rsqrt %12 : vector<8x8xf32>
    %cst_8 = arith.constant dense<0.000000e+00> : vector<8x128xf32>
    %14 = tpu.matmul %13, %1, %cst_8 {dimension_numbers = #tpu.dot_dimension_numbers<[1], [0], [0], [1], [0, 0, 1, 1], [], []>} : vector<8x8xf32>, vector<8x128xf32>, vector<8x128xf32> -> vector<8x128xf32>
    %15 = arith.mulf %6, %14 : vector<8x128xf32>
    %c0_9 = arith.constant 0 : index
    %c0_10 = arith.constant 0 : index
    %16 = vector.load %arg4[%c0_9, %c0_10] : memref<128x128xf32, #tpu.memory_space<vmem>>, vector<128x128xf32>
    %cst_11 = arith.constant dense<0.000000e+00> : vector<8x128xf32>
    %17 = tpu.matmul %15, %16, %cst_11 {dimension_numbers = #tpu.dot_dimension_numbers<[1], [0], [0], [1], [0, 0, 1, 1], [], []>} : vector<8x128xf32>, vector<128x128xf32>, vector<8x128xf32> -> vector<8x128xf32>
    %c0_12 = arith.constant 0 : index
    %c0_13 = arith.constant 0 : index
    %18 = vector.load %arg5[%c0_12, %c0_13] : memref<1x128xf32, #tpu.memory_space<vmem>>, vector<1x128xf32>
    %19 = vector.broadcast %18 : vector<1x128xf32> to vector<8x128xf32>
    %20 = arith.addf %17, %19 : vector<8x128xf32>
    %c0_14 = arith.constant 0 : index
    %c0_15 = arith.constant 0 : index
    %21 = vector.load %arg6[%c0_14, %c0_15] : memref<8x128xf32, #tpu.memory_space<vmem>>, vector<8x128xf32>
    tpu.vector_store %arg6[%c0_14, %c0_15], %20 {strides = array<i32>} : memref<8x128xf32, #tpu.memory_space<vmem>>, vector<8x128xf32>,
    return
  }
  func.func @transform_0(%arg0: i32, %arg1: i32) -> (i32, i32) {
    %c0_i32 = arith.constant 0 : i32
    %c0_i32_0 = arith.constant 0 : i32
    return %arg0, %c0_i32 : i32, i32
  }
  func.func @transform_1(%arg0: i32, %arg1: i32) -> (i32, i32) {
    %c0_i32 = arith.constant 0 : i32
    %c0_i32_0 = arith.constant 0 : i32
    %c0_i32_1 = arith.constant 0 : i32
    return %c0_i32, %c0_i32_0 : i32, i32
  }
  func.func @transform_2(%arg0: i32, %arg1: i32) -> (i32, i32) {
    %c0_i32 = arith.constant 0 : i32
    %c0_i32_0 = arith.constant 0 : i32
    return %c0_i32, %arg1 : i32, i32
  }
  func.func @transform_3(%arg0: i32, %arg1: i32) -> (i32, i32) {
    %c0_i32 = arith.constant 0 : i32
    %c0_i32_0 = arith.constant 0 : i32
    return %c0_i32, %arg1 : i32, i32
  }
  func.func @transform_4(%arg0: i32, %arg1: i32) -> (i32, i32) {
    %c0_i32 = arith.constant 0 : i32
    return %arg0, %arg1 : i32, i32
  }
}

</mosaic_0001>

<bundles_post_ra>
// kernel: tile.8
= control target key start
LH: loop header
LB: loop body
LE: loop exit
PB: predicated region body
PF: predicated region fallthrough
CT: control target
= control target key end

     0   :  { %s22_s0 = inlined_call_operand.vmem [shape: f32[32], index: 0, kind: input, shape index: {}]   ;;  %s23_s1 = inlined_call_operand.vmem [shape: f32[4,32], index: 1, kind: output, shape index: {}]  }
   0x1   :  { %v4_v0 = vld [vmem:[%s22_s0] ss:$0 sm:$0xff] }
   0x2   :  { %5 = vst [vmem:[%s23_s1] sm:$0xf] %v4_v0 }

// kernel: tile.9
= control target key start
LH: loop header
LB: loop body
LE: loop exit
PB: predicated region body
PF: predicated region fallthrough
CT: control target
= control target key end

     0   :  { %vm8_vm0 = vcmask 261120   ;;  %s40_s8 = smov 32   ;;  %s41_s9 = smov 64   ;;  %vm14_vm1 = vcmask 1048320   ;;  %vm20_vm2 = vcmask 785920   ;;  %vm26_vm3 = vcmask 523520   ;;  %s58_s0 = inlined_call_operand.vmem [shape: f32[4,32], index: 0, kind: input, shape index: {}]   ;;  %s59_s1 = inlined_call_operand.vmem [shape: f32[1,128], index: 1, kind: output, shape index: {}]  }
   0x1   :  { %v5_v0 = vld [vmem:[%s58_s0] sm:$0xf]  ;;  %s39_s0 = smov 96  }
   0x2   :  { %6 = vst [vmem:[#allocation1] sm:$0xf] %v5_v0 }
   0x9   :  { %v11_v1 = vld [vmem:[#allocation1 + $0x3] sm:$0x1]   ;;  %v23_v2 = vld [vmem:[#allocation1 + $0x1] sm:$0x1]   ;;  %v7_v3 = vld [vmem:[#allocation1] sm:$0x1]  }
   0xa   :  { %12 = vrot.lane.b32.xlu0 %v11_v1, %s39_s0  ;;  %24 = vrot.lane.b32.xlu1 %v23_v2, %s40_s8  ;;  %v17_v4 = vld [vmem:[#allocation1 + $0x2] sm:$0x1]   ;;  %9 = vst.msk [vmem:[#allocation0] sm:$0x1] %vm8_vm0, %v7_v3  }
   0xe   :  { %18 = vrot.lane.b32.xlu0 %v17_v4, %s41_s9 }
  0x7c   :  { %v13_v5 = vpop.permute.xlu0 %12   ;;  %v25_v6 = vpop.permute.xlu1 %24  }
  0x7d   :  { %15 = vst.msk [vmem:[#allocation0] sm:$0x1] %vm14_vm1, %v13_v5  }
  0x80   :  { %v19_v7 = vpop.permute.xlu0 %18  }
  0x81   :  { %21 = vst.msk [vmem:[#allocation0] sm:$0x1] %vm20_vm2, %v19_v7  }
  0x82   :  { %27 = vst.msk [vmem:[#allocation0] sm:$0x1] %vm26_vm3, %v25_v6  }
  0x89   :  { %v32_v8 = vld [vmem:[#allocation0] sm:$0x1] }
  0x8a   :  { %35 = vst [vmem:[%s59_s1] sm:$0x1] %v32_v8 }

// kernel: prenorm_linear.1
= control target key start
LH: loop header
LB: loop body
LE: loop exit
PB: predicated region body
PF: predicated region fallthrough
CT: control target
= control target key end

     0   :  { %v535_v1 = vmov 0.0   ;;  %vm536_vm0 = vmmov 0   ;;  %vm90_vm1 = vcmask 64512   ;;  %s654_s0 = inlined_call_operand.vmem [shape: f32[4,128], index: 0, kind: input, shape index: {}]   ;;  %s655_s1 = inlined_call_operand.vmem [shape: f32[8,128], index: 1, kind: input, shape index: {}]   ;;  %s656_s2 = inlined_call_operand.vmem [shape: f32[128,128], index: 2, kind: input, shape index: {}]   ;;  %s657_s3 = inlined_call_operand.vmem [shape: f32[1,128], index: 3, kind: input, shape index: {}]   ;;  %s658_s4 = inlined_call_operand.vmem [shape: f32[4,128], index: 4, kind: output, shape index: {}]  }
   0x1   :  { %v18_v0 = vld [vmem:[%s655_s1] sm:$0xff]  ;;  %476 = vmatprep.subr.mxu0 %v535_v1  ;;  %478 = vmatprep.mubr.msk.f32.mxu0 %vm536_vm0, %v535_v1  ;;  %v328_v10 = vld [vmem:[%s656_s2 + $0x78] sm:$0xff]  ;;  %v327_v11 = vld [vmem:[%s656_s2 + $0x70] sm:$0xff] }
   0x2   :  { %477 = vmatpush3.xpose.msra.mxu0 %v18_v0  ;;  %v17_v2 = vld [vmem:[%s654_s0] sm:$0xff]  ;;  %496 = vmatprep.subr.mxu1 %v535_v1  ;;  %v326_v12 = vld [vmem:[%s656_s2 + $0x68] sm:$0xff]  ;;  %v324_v14 = vld [vmem:[%s656_s2 + $0x58] sm:$0xff] }
   0x3   :  { %481 = vmatprep.subr.mxu0 %v535_v1  ;;  %528 = vmatprep.mubr.msk.f32.mxu1 %vm536_vm0, %v535_v1  ;;  %v325_v13 = vld [vmem:[%s656_s2 + $0x60] sm:$0xff]  ;;  %v323_v15 = vld [vmem:[%s656_s2 + $0x50] sm:$0xff]  ;;  %v322_v16 = vld [vmem:[%s656_s2 + $0x48] sm:$0xff] }
   0x4   :  { %497 = vmatpush3.msra.mxu1 %v328_v10  ;;  %v321_v17 = vld [vmem:[%s656_s2 + $0x40] sm:$0xff]  ;;  %v320_v18 = vld [vmem:[%s656_s2 + $0x38] sm:$0xff]  ;;  %v319_v19 = vld [vmem:[%s656_s2 + $0x30] sm:$0xff] }
   0x5   :  { %479 = vmatmul.mubr.f32.vlgmr.msra.gmra.mxu0 %v17_v2  ;;  %498 = vmatprep.subr.mxu1 %v535_v1  ;;  %v318_v20 = vld [vmem:[%s656_s2 + $0x28] sm:$0xff]  ;;  %v317_v21 = vld [vmem:[%s656_s2 + $0x20] sm:$0xff]  ;;  %v316_v22 = vld [vmem:[%s656_s2 + $0x18] sm:$0xff] }
   0x6   :  { %482 = vmatpush3.msra.mxu0 %v18_v0  ;;  %483 = vmatprep.mubr.msk.f32.mxu0 %vm536_vm0, %v535_v1  ;;  %v315_v23 = vld [vmem:[%s656_s2 + $0x10] sm:$0xff]  ;;  %v314_v29 = vld [vmem:[%s656_s2 + $0x8] sm:$0xff]  ;;  %v313_v30 = vld [vmem:[%s656_s2] sm:$0xff] }
   0x7   :  { %486 = vmatprep.subr.mxu0 %v535_v1  ;;  %499 = vmatpush3.msra.mxu1 %v327_v11  ;;  %v450_v34 = vld [vmem:[%s657_s3] ss:$0 sm:$0xff] }
   0x8   :  { %500 = vmatprep.subr.mxu1 %v535_v1 }
   0x9   :  { %501 = vmatpush3.msra.mxu1 %v326_v12 }
   0xa   :  { %502 = vmatprep.subr.mxu1 %v535_v1 }
   0xb   :  { %503 = vmatpush3.msra.mxu1 %v325_v13 }
   0xc   :  { %504 = vmatprep.subr.mxu1 %v535_v1 }
   0xd   :  { %505 = vmatpush3.msra.mxu1 %v324_v14 }
   0xe   :  { %506 = vmatprep.subr.mxu1 %v535_v1 }
   0xf   :  { %507 = vmatpush3.msra.mxu1 %v323_v15 }
  0x10   :  { %508 = vmatprep.subr.mxu1 %v535_v1 }
  0x11   :  { %509 = vmatpush3.msra.mxu1 %v322_v16 }
  0x12   :  { %510 = vmatprep.subr.mxu1 %v535_v1 }
  0x13   :  { %511 = vmatpush3.msra.mxu1 %v321_v17 }
  0x14   :  { %512 = vmatprep.subr.mxu1 %v535_v1 }
  0x15   :  { %513 = vmatpush3.msra.mxu1 %v320_v18 }
  0x16   :  { %514 = vmatprep.subr.mxu1 %v535_v1 }
  0x17   :  { %515 = vmatpush3.msra.mxu1 %v319_v19 }
  0x18   :  { %516 = vmatprep.subr.mxu1 %v535_v1 }
  0x19   :  { %517 = vmatpush3.msra.mxu1 %v318_v20 }
  0x1a   :  { %518 = vmatprep.subr.mxu1 %v535_v1 }
  0x1b   :  { %519 = vmatpush3.msra.mxu1 %v317_v21 }
  0x1c   :  { %520 = vmatprep.subr.mxu1 %v535_v1 }
  0x1d   :  { %521 = vmatpush3.msra.mxu1 %v316_v22 }
  0x1e   :  { %522 = vmatprep.subr.mxu1 %v535_v1 }
  0x1f   :  { %523 = vmatpush3.msra.mxu1 %v315_v23 }
  0x20   :  { %524 = vmatprep.subr.mxu1 %v535_v1 }
  0x21   :  { %525 = vmatpush3.msra.mxu1 %v314_v29 }
  0x22   :  { %526 = vmatprep.subr.mxu1 %v535_v1 }
  0x23   :  { %527 = vmatpush3.msra.mxu1 %v313_v30 }
  0xc5   :  { %v85_v3 = vpop.f32.mrf.mxu0 }
  0xc6   :  { %v89_v4 = vmul.f32 0.03125, %v85_v3 }
  0xc7   :  { %v480_v5 = vpop.f32.mrf.mxu0 }
  0xc8   :  { %484 = vmatmul.mubr.msk.f32.vlgmr.msra.gmra.mxu0 %vm90_vm1, %v89_v4 }
  0xc9   :  { %487 = vmatpush3.xpose.msra.mxu0 %v18_v0  ;;  %488 = vmatprep.mubr.msk.f32.mxu0 %vm536_vm0, %v535_v1 }
  0xca   :  { %491 = vmatprep.subr.mxu0 %v535_v1 }
 0x188   :  { %v160_v6 = vpop.f32.mrf.mxu0 }
 0x189   :  { %v164_v7 = vsub.f32 %v17_v2, %v160_v6 }
 0x18a   :  { %v485_v8 = vpop.f32.mrf.mxu0 }
 0x18b   :  { %v165_v9 = vmul.f32 %v164_v7, %v164_v7 }
 0x18d   :  { %489 = vmatmul.mubr.f32.vlgmr.msra.gmra.mxu0 %v165_v9 }
 0x18e   :  { %492 = vmatpush3.msra.mxu0 %v18_v0  ;;  %493 = vmatprep.mubr.msk.f32.mxu0 %vm536_vm0, %v535_v1 }
 0x24d   :  { %v232_v24 = vpop.f32.mrf.mxu0 }
 0x24e   :  { %v236_v25 = vmul.f32 0.03125, %v232_v24 }
 0x24f   :  { %v490_v26 = vpop.f32.mrf.mxu0 }
 0x250   :  { %v237_v27 = vadd.f32 1e-05, %v236_v25 }
 0x252   :  { %533 = vrsqrt.f32 %v237_v27 }
 0x25f   :  { %v534_v28 = vpop.eup %533 }
 0x260   :  { %494 = vmatmul.mubr.msk.f32.vlgmr.msra.gmra.mxu0 %vm90_vm1, %v534_v28 }
 0x320   :  { %v308_v31 = vpop.f32.mrf.mxu0 }
 0x321   :  { %v312_v32 = vmul.f32 %v308_v31, %v164_v7 }
 0x322   :  { %v495_v33 = vpop.f32.mrf.mxu0 }
 0x323   :  { %529 = vmatmul.mubr.f32.vlgmr.msra.gmra.mxu1 %v312_v32 }
 0x3e3   :  { %v402_v35 = vpop.f32.mrf.mxu1 }
 0x3e4   :  { %v403_v36 = vadd.f32 %v450_v34, %v402_v35 }
 0x3e5   :  { %v530_v37 = vpop.f32.mrf.mxu1 }
 0x3e6   :  { %406 = vst [vmem:[#allocation2] sm:$0xff] %v403_v36 }
 0x3ed   :  { %v425_v38 = vld [vmem:[#allocation2] sm:$0xf] }
 0x3ee   :  { %426 = vst [vmem:[%s658_s4] sm:$0xf] %v425_v38 }

</bundles_post_ra>
